<compile_context>
chip_gen: v6e
topology: v6e:2x2x1
jax: 0.10.0
libtpu: 0.0.40
codegen_flags: <defaults>
</compile_context>

<pallas_src>
import functools

import jax
import jax.numpy as jnp
from jax.experimental import pallas as pl
from jax.experimental.pallas import tpu as pltpu


LANE = 128      # padded width for hidden layers (50 -> 128, 100 -> 128)
MAX_TM = 512    # batch-tile cap (multiple of 256; 512*D*4B stays tiny in VMEM)


def _round_up(n, m):
    return ((n + m - 1) // m) * m


def _bin_model_kernel(scal_ref,      # SMEM (1, 2): [alpha, b3]
                      x_ref,         # VMEM (TM, D)    real input width, no lane pad
                      w1_ref,        # VMEM (D, 128)
                      b12_ref,       # VMEM (2, 128): row0 = b1, row1 = b2
                      w2_ref,        # VMEM (128, 128)
                      w3_ref,        # VMEM (128, 1)
                      o_ref):        # VMEM (TM, 1)
    x = x_ref[...]

    # fc1 + ReLU
    a1 = jnp.dot(x, w1_ref[...], preferred_element_type=jnp.float32) + b12_ref[0:1, :]
    h1 = jnp.maximum(a1, 0.0)

    # Dropout(p=0.2): identity in eval mode.
    # TODO(synk): training-mode dropout (pltpu.prng_random_bits mask) not emitted.

    # fc2 + PReLU(1)
    a2 = jnp.dot(h1, w2_ref[...], preferred_element_type=jnp.float32) + b12_ref[1:2, :]
    alpha = scal_ref[0, 0]
    h2 = jnp.where(a2 > 0.0, a2, alpha * a2)

    # out + Sigmoid — only the single valid output column is computed/stored.
    a3 = jnp.dot(h2, w3_ref[...], preferred_element_type=jnp.float32) + scal_ref[0, 1]
    o_ref[...] = jax.nn.sigmoid(a3)


@functools.partial(jax.jit, static_argnames=("input_size",))
def bin_model_forward(x, params, *, input_size):
    """x: (B, input_size) float32 -> (B, 1) float32."""
    w1, b1, w2, b2, alpha, w3, b3 = (
        params["w1"], params["b1"], params["w2"], params["b2"],
        params["alpha"], params["w3"], params["b3"],
    )
    B = x.shape[0]

    # Adaptive batch tile: big enough to feed the MXU / amortize grid-step
    # overhead for large B, but never pads small batches by more than 7 rows.
    TM = min(MAX_TM, _round_up(B, 8))
    B_pad = _round_up(B, TM)

    x_p = x.astype(jnp.float32)
    if B_pad != B:
        x_p = jnp.pad(x_p, ((0, B_pad - B), (0, 0)))   # rows only, never lanes

    # Tiny grid-invariant weight slabs (zero-padded lanes stay exactly 0 through
    # ReLU/PReLU, so padded hidden columns contribute nothing).
    w1_p = jnp.pad(w1.astype(jnp.float32), ((0, 0), (0, LANE - w1.shape[1])))       # (D, 128)
    w2_p = jnp.pad(w2.astype(jnp.float32),
                   ((0, LANE - w2.shape[0]), (0, LANE - w2.shape[1])))              # (128, 128)
    w3_p = jnp.pad(w3.astype(jnp.float32), ((0, LANE - w3.shape[0]), (0, 0)))       # (128, 1)
    b12 = jnp.stack([
        jnp.pad(b1.astype(jnp.float32), (0, LANE - b1.shape[0])),
        jnp.pad(b2.astype(jnp.float32), (0, LANE - b2.shape[0])),
    ])                                                                              # (2, 128)
    scal = jnp.concatenate([alpha.reshape(1), b3.reshape(1)]).astype(
        jnp.float32).reshape(1, 2)                                                  # (1, 2)

    grid = (B_pad // TM,)
    out = pl.pallas_call(
        _bin_model_kernel,
        out_shape=jax.ShapeDtypeStruct((B_pad, 1), jnp.float32),
        grid_spec=pltpu.PrefetchScalarGridSpec(
            num_scalar_prefetch=0,
            grid=grid,
            in_specs=[
                pl.BlockSpec((1, 2), lambda i: (0, 0),
                             memory_space=pltpu.SMEM),              # [alpha, b3]
                pl.BlockSpec((TM, input_size), lambda i: (i, 0)),   # x tile (real width)
                pl.BlockSpec((input_size, LANE), lambda i: (0, 0)),  # w1
                pl.BlockSpec((2, LANE), lambda i: (0, 0)),           # b1/b2 slab
                pl.BlockSpec((LANE, LANE), lambda i: (0, 0)),        # w2
                pl.BlockSpec((LANE, 1), lambda i: (0, 0)),           # w3 (1 valid col)
            ],
            out_specs=pl.BlockSpec((TM, 1), lambda i: (i, 0)),
        ),
        compiler_params=pltpu.CompilerParams(
            dimension_semantics=("parallel",)),
    )(scal, x_p, w1_p, b12, w2_p, w3_p)

    if B_pad != B:
        out = out[:B]
    return out


def init_params(key, input_size):
    """Deterministic init mimicking PyTorch nn.Linear defaults (U(-1/sqrt(fan_in), ..))."""
    def linear(k, fan_in, fan_out):
        kw, kb = jax.random.split(k)
        bound = 1.0 / jnp.sqrt(fan_in)
        w = jax.random.uniform(kw, (fan_in, fan_out), jnp.float32, -bound, bound)
        b = jax.random.uniform(kb, (fan_out,), jnp.float32, -bound, bound)
        return w, b

    k1, k2, k3 = jax.random.split(key, 3)
    w1, b1 = linear(k1, input_size, 50)
    w2, b2 = linear(k2, 50, 100)
    w3, b3 = linear(k3, 100, 1)
    alpha = jnp.array([0.25], dtype=jnp.float32)   # nn.PReLU(1) default
    return dict(w1=w1, b1=b1, w2=w2, b2=b2, alpha=alpha, w3=w3, b3=b3)


def reference_forward(x, params):
    a1 = x @ params["w1"] + params["b1"]
    h1 = jnp.maximum(a1, 0.0)
    a2 = h1 @ params["w2"] + params["b2"]
    h2 = jnp.where(a2 > 0, a2, params["alpha"][0] * a2)
    a3 = h2 @ params["w3"] + params["b3"]
    return jax.nn.sigmoid(a3)


if __name__ == "__main__":
    input_size = 32
    batch = 8

    key = jax.random.PRNGKey(0)
    kx, kp = jax.random.split(key)
    x = jax.random.normal(kx, (batch, input_size), dtype=jnp.float32)
    params = init_params(kp, input_size)

    y = bin_model_forward(x, params, input_size=input_size)
    jax.block_until_ready(y)

    y_ref = reference_forward(x, params)
    assert y.shape == (batch, 1)
    assert jnp.allclose(y, y_ref, atol=1e-5, rtol=1e-5)
    print("KERNEL_OK")
</pallas_src>

<mosaic_0001>
module attributes {stable_mosaic.version = 11 : i64} {
  func.func @_bin_model_kernel(%arg0: i32, %arg1: memref<1x2xf32, #tpu.memory_space<smem>>, %arg2: memref<8x32xf32, #tpu.memory_space<vmem>>, %arg3: memref<32x128xf32, #tpu.memory_space<vmem>>, %arg4: memref<2x128xf32, #tpu.memory_space<vmem>>, %arg5: memref<128x128xf32, #tpu.memory_space<vmem>>, %arg6: memref<128x1xf32, #tpu.memory_space<vmem>>, %arg7: memref<8x1xf32, #tpu.memory_space<vmem>>) attributes {dimension_semantics = [#tpu.dimension_semantics<parallel>], iteration_bounds = array<i64: 1>, scalar_prefetch = 0 : i64, scratch_operands = 0 : i64, tpu.core_type = #tpu.core_type<tc>, window_params = [{transform_indices = @transform_0, window_bounds = array<i64: 1, 2>}, {transform_indices = @transform_1, window_bounds = array<i64: 8, 32>}, {pipeline_mode = #tpu.pipeline_mode<synchronous>, transform_indices = @transform_2, window_bounds = array<i64: 32, 128>}, {pipeline_mode = #tpu.pipeline_mode<synchronous>, transform_indices = @transform_3, window_bounds = array<i64: 2, 128>}, {pipeline_mode = #tpu.pipeline_mode<synchronous>, transform_indices = @transform_4, window_bounds = array<i64: 128, 128>}, {pipeline_mode = #tpu.pipeline_mode<synchronous>, transform_indices = @transform_5, window_bounds = array<i64: 128, 1>}, {transform_indices = @transform_6, window_bounds = array<i64: 8, 1>}]} {
    %c0 = arith.constant 0 : index
    %c0_0 = arith.constant 0 : index
    %0 = vector.load %arg2[%c0, %c0_0] : memref<8x32xf32, #tpu.memory_space<vmem>>, vector<8x32xf32>
    %c0_1 = arith.constant 0 : index
    %c0_2 = arith.constant 0 : index
    %1 = vector.load %arg3[%c0_1, %c0_2] : memref<32x128xf32, #tpu.memory_space<vmem>>, vector<32x128xf32>
    %cst = arith.constant dense<0.000000e+00> : vector<8x128xf32>
    %2 = tpu.matmul %0, %1, %cst {dimension_numbers = #tpu.dot_dimension_numbers<[1], [0], [0], [1], [0, 0, 1, 1], [], []>} : vector<8x32xf32>, vector<32x128xf32>, vector<8x128xf32> -> vector<8x128xf32>
    %c0_3 = arith.constant 0 : index
    %c0_4 = arith.constant 0 : index
    %3 = vector.load %arg4[%c0_3, %c0_4] : memref<2x128xf32, #tpu.memory_space<vmem>>, vector<1x128xf32>
    %4 = vector.broadcast %3 : vector<1x128xf32> to vector<8x128xf32>
    %5 = arith.addf %2, %4 : vector<8x128xf32>
    %cst_5 = arith.constant 0.000000e+00 : f32
    %6 = vector.broadcast %cst_5 : f32 to vector<8x128xf32>
    %7 = arith.maximumf %5, %6 : vector<8x128xf32>
    %c0_6 = arith.constant 0 : index
    %c0_7 = arith.constant 0 : index
    %8 = vector.load %arg5[%c0_6, %c0_7] : memref<128x128xf32, #tpu.memory_space<vmem>>, vector<128x128xf32>
    %cst_8 = arith.constant dense<0.000000e+00> : vector<8x128xf32>
    %9 = tpu.matmul %7, %8, %cst_8 {dimension_numbers = #tpu.dot_dimension_numbers<[1], [0], [0], [1], [0, 0, 1, 1], [], []>} : vector<8x128xf32>, vector<128x128xf32>, vector<8x128xf32> -> vector<8x128xf32>
    %c1 = arith.constant 1 : index
    %c0_9 = arith.constant 0 : index
    %10 = vector.load %arg4[%c1, %c0_9] : memref<2x128xf32, #tpu.memory_space<vmem>>, vector<1x128xf32>
    %11 = vector.broadcast %10 : vector<1x128xf32> to vector<8x128xf32>
    %12 = arith.addf %9, %11 : vector<8x128xf32>
    %c0_10 = arith.constant 0 : index
    %c0_11 = arith.constant 0 : index
    %13 = memref.load %arg1[%c0_10, %c0_11] : memref<1x2xf32, #tpu.memory_space<smem>>
    %cst_12 = arith.constant 0.000000e+00 : f32
    %14 = vector.broadcast %cst_12 : f32 to vector<8x128xf32>
    %15 = arith.cmpf ogt, %12, %14 : vector<8x128xf32>
    %16 = vector.broadcast %13 : f32 to vector<8x128xf32>
    %17 = arith.mulf %16, %12 : vector<8x128xf32>
    %18 = arith.select %15, %12, %17 : vector<8x128xi1>, vector<8x128xf32>
    %c0_13 = arith.constant 0 : index
    %c0_14 = arith.constant 0 : index
    %19 = vector.load %arg6[%c0_13, %c0_14] : memref<128x1xf32, #tpu.memory_space<vmem>>, vector<128x1xf32>
    %cst_15 = arith.constant dense<0.000000e+00> : vector<8x1xf32>
    %20 = tpu.matmul %18, %19, %cst_15 {dimension_numbers = #tpu.dot_dimension_numbers<[1], [0], [0], [1], [0, 0, 1, 1], [], []>} : vector<8x128xf32>, vector<128x1xf32>, vector<8x1xf32> -> vector<8x1xf32>
    %c0_16 = arith.constant 0 : index
    %c1_17 = arith.constant 1 : index
    %21 = memref.load %arg1[%c0_16, %c1_17] : memref<1x2xf32, #tpu.memory_space<smem>>
    %22 = vector.broadcast %21 : f32 to vector<8x1xf32>
    %23 = arith.addf %20, %22 : vector<8x1xf32>
    %24 = arith.negf %23 : vector<8x1xf32>
    %25 = math.exp %24 : vector<8x1xf32>
    %cst_18 = arith.constant 1.000000e+00 : f32
    %26 = vector.broadcast %cst_18 : f32 to vector<8x1xf32>
    %27 = arith.addf %26, %25 : vector<8x1xf32>
    %28 = arith.divf %26, %27 : vector<8x1xf32>
    %c0_19 = arith.constant 0 : index
    %c0_20 = arith.constant 0 : index
    %29 = vector.load %arg7[%c0_19, %c0_20] : memref<8x1xf32, #tpu.memory_space<vmem>>, vector<8x1xf32>
    tpu.vector_store %arg7[%c0_19, %c0_20], %28 {strides = array<i32>} : memref<8x1xf32, #tpu.memory_space<vmem>>, vector<8x1xf32>,
    return
  }
  func.func @transform_0(%arg0: i32) -> (i32, i32) {
    %c0_i32 = arith.constant 0 : i32
    %c0_i32_0 = arith.constant 0 : i32
    %c0_i32_1 = arith.constant 0 : i32
    return %c0_i32, %c0_i32_0 : i32, i32
  }
  func.func @transform_1(%arg0: i32) -> (i32, i32) {
    %c0_i32 = arith.constant 0 : i32
    %c0_i32_0 = arith.constant 0 : i32
    return %arg0, %c0_i32 : i32, i32
  }
  func.func @transform_2(%arg0: i32) -> (i32, i32) {
    %c0_i32 = arith.constant 0 : i32
    %c0_i32_0 = arith.constant 0 : i32
    %c0_i32_1 = arith.constant 0 : i32
    return %c0_i32, %c0_i32_0 : i32, i32
  }
  func.func @transform_3(%arg0: i32) -> (i32, i32) {
    %c0_i32 = arith.constant 0 : i32
    %c0_i32_0 = arith.constant 0 : i32
    %c0_i32_1 = arith.constant 0 : i32
    return %c0_i32, %c0_i32_0 : i32, i32
  }
  func.func @transform_4(%arg0: i32) -> (i32, i32) {
    %c0_i32 = arith.constant 0 : i32
    %c0_i32_0 = arith.constant 0 : i32
    %c0_i32_1 = arith.constant 0 : i32
    return %c0_i32, %c0_i32_0 : i32, i32
  }
  func.func @transform_5(%arg0: i32) -> (i32, i32) {
    %c0_i32 = arith.constant 0 : i32
    %c0_i32_0 = arith.constant 0 : i32
    %c0_i32_1 = arith.constant 0 : i32
    return %c0_i32, %c0_i32_0 : i32, i32
  }
  func.func @transform_6(%arg0: i32) -> (i32, i32) {
    %c0_i32 = arith.constant 0 : i32
    %c0_i32_0 = arith.constant 0 : i32
    return %arg0, %c0_i32 : i32, i32
  }
}

</mosaic_0001>

<bundles_post_ra>
// kernel: bin_model_forward.1
= control target key start
LH: loop header
LB: loop body
LE: loop exit
PB: predicated region body
PF: predicated region fallthrough
CT: control target
= control target key end

     0   :  { %11 = vsyncpa [#allocation3], 0  ;;  %s667_s0 = inlined_call_operand.vmem [shape: f32[1,2], index: 0, kind: input, shape index: {}]   ;;  %s668_s1 = inlined_call_operand.vmem [shape: f32[8,32], index: 1, kind: input, shape index: {}]   ;;  %s669_s2 = inlined_call_operand.vmem [shape: f32[32,128], index: 2, kind: input, shape index: {}]   ;;  %s670_s3 = inlined_call_operand.vmem [shape: f32[2,128], index: 3, kind: input, shape index: {}]   ;;  %s671_s4 = inlined_call_operand.vmem [shape: f32[128,128], index: 4, kind: input, shape index: {}]   ;;  %s672_s5 = inlined_call_operand.vmem [shape: f32[128,1], index: 5, kind: input, shape index: {}]   ;;  %s673_s6 = inlined_call_operand.vmem [shape: f32[8,1], index: 6, kind: output, shape index: {}]  }
   0x1   :  { %s18_s23 = sshll.u32 %s667_s0, 4  ;;  %s19_s23 = int_to_ptr.vmem [resolvable:$true] %s18_s23 }
   0x2   :  { %s450_s24 = scalar_lea.vmem %s19_s23, 16  ;;  %p455_p1 = scmp.lt.s32.totalorder %s19_s23, %s19_s23 }
   0x3   :  { %p451_p0 = scmp.ne.s32.totalorder %s19_s23, %s450_s24  ;;  %p456_p2 = scmp.lt.s32.totalorder %s450_s24, %s450_s24 }
   0x5   :  { %p457_p3 = por %p456_p2, %p455_p1 }
   0x7   :  { %p458_p4 = pnand %p457_p3, %p451_p0 }
   0x9   :  { %461 = shalt.err (!%p458_p4)
}
   0xa   :  { %s464_s25 = smov [#allocation2]  }
   0xb   :  { %21 = dma.vmem_to_smem %s19_s23, 16, %s464_s25, [#allocation3]  }
   0xc   :  { %462 = dma.done.wait [#allocation3], 16  }
   0xd   :  { %463 = vsyncadd [#allocation3], 4294967280 }
   0xe   :  { %35 = sfence }
   0xf   :  { %v40_v0 = vld [vmem:[%s669_s2 + $0x18] sm:$0xff]  ;;  %v465_v1 = vmov 0.0   ;;  %v39_v2 = vld [vmem:[%s669_s2 + $0x10] sm:$0xff]  ;;  %vm466_vm0 = vmmov 0   ;;  %v38_v5 = vld [vmem:[%s669_s2 + $0x8] sm:$0xff]  ;;  %vm46_vm1 = vcmask 261120  }
  0x10   :  { %362 = vmatprep.subr.mxu0 %v465_v1  ;;  %370 = vmatprep.mubr.msk.f32.mxu0 %vm466_vm0, %v465_v1  ;;  %v136_v3 = vld [vmem:[%s671_s4 + $0x78] sm:$0xff]  ;;  %v135_v4 = vld [vmem:[%s671_s4 + $0x70] sm:$0xff]  ;;  %v134_v6 = vld [vmem:[%s671_s4 + $0x68] sm:$0xff]  ;;  %s321_s22 = sld [smem:[#allocation2 + $0x1]]  ;;  %vm311_vm3 = vcmask 7168  }
  0x11   :  { %363 = vmatpush3.msra.mxu0 %v40_v0  ;;  %373 = vmatprep.subr.mxu1 %v465_v1  ;;  %v37_v7 = vld [vmem:[%s669_s2] sm:$0xff]  ;;  %v132_v10 = vld [vmem:[%s671_s4 + $0x58] sm:$0xff]  ;;  %v131_v11 = vld [vmem:[%s671_s4 + $0x50] sm:$0xff] }
  0x12   :  { %364 = vmatprep.subr.mxu0 %v465_v1  ;;  %374 = vmatpush3.msra.mxu1 %v136_v3  ;;  %v36_v8 = vld [vmem:[%s668_s1] sm:$0xff]  ;;  %v130_v12 = vld [vmem:[%s671_s4 + $0x48] sm:$0xff]  ;;  %v128_v14 = vld [vmem:[%s671_s4 + $0x38] sm:$0xff] }
  0x13   :  { %365 = vmatpush3.msra.mxu0 %v39_v2  ;;  %375 = vmatprep.subr.mxu1 %v465_v1  ;;  %v133_v9 = vld [vmem:[%s671_s4 + $0x60] sm:$0xff]  ;;  %v127_v15 = vld [vmem:[%s671_s4 + $0x30] sm:$0xff]  ;;  %v126_v16 = vld [vmem:[%s671_s4 + $0x28] sm:$0xff] }
  0x14   :  { %366 = vmatprep.subr.mxu0 %v465_v1  ;;  %376 = vmatpush3.msra.mxu1 %v135_v4  ;;  %v129_v13 = vld [vmem:[%s671_s4 + $0x40] sm:$0xff]  ;;  %v124_v18 = vld [vmem:[%s671_s4 + $0x18] sm:$0xff]  ;;  %v123_v19 = vld [vmem:[%s671_s4 + $0x10] sm:$0xff] }
  0x15   :  { %367 = vmatpush3.msra.mxu0 %v38_v5  ;;  %377 = vmatprep.subr.mxu1 %v465_v1  ;;  %v125_v17 = vld [vmem:[%s671_s4 + $0x20] sm:$0xff]  ;;  %v122_v20 = vld [vmem:[%s671_s4 + $0x8] sm:$0xff]  ;;  %v232_v22 = vld [vmem:[%s672_s5 + $0x78] sm:$0xff] }
  0x16   :  { %368 = vmatprep.subr.mxu0 %v465_v1  ;;  %378 = vmatpush3.msra.mxu1 %v134_v6  ;;  %v121_v21 = vld [vmem:[%s671_s4] sm:$0xff]  ;;  %v231_v23 = vld [vmem:[%s672_s5 + $0x70] sm:$0xff]  ;;  %v230_v24 = vld [vmem:[%s672_s5 + $0x68] sm:$0xff]  ;;  %s212_s4 = sld [smem:[#allocation2]]  ;;  %v234_v50 = vstv %s321_s22 }
  0x17   :  { %369 = vmatpush3.msra.mxu0 %v37_v7  ;;  %379 = vmatprep.subr.mxu1 %v465_v1  ;;  %v229_v25 = vld [vmem:[%s672_s5 + $0x60] sm:$0xff]  ;;  %v228_v26 = vld [vmem:[%s672_s5 + $0x58] sm:$0xff]  ;;  %v227_v27 = vld [vmem:[%s672_s5 + $0x50] sm:$0xff] }
  0x18   :  { %371 = vmatmul.mubr.msk.f32.vlgmr.msra.gmra.mxu0 %vm46_vm1, %v36_v8  ;;  %380 = vmatpush3.msra.mxu1 %v133_v9  ;;  %v226_v28 = vld [vmem:[%s672_s5 + $0x48] sm:$0xff]  ;;  %v225_v29 = vld [vmem:[%s672_s5 + $0x40] sm:$0xff]  ;;  %v224_v30 = vld [vmem:[%s672_s5 + $0x38] sm:$0xff] }
  0x19   :  { %381 = vmatprep.subr.mxu1 %v465_v1  ;;  %405 = vmatprep.mubr.msk.f32.mxu1 %vm466_vm0, %v465_v1  ;;  %v223_v31 = vld [vmem:[%s672_s5 + $0x30] sm:$0xff]  ;;  %v222_v32 = vld [vmem:[%s672_s5 + $0x28] sm:$0xff]  ;;  %v221_v33 = vld [vmem:[%s672_s5 + $0x20] sm:$0xff] }
  0x1a   :  { %382 = vmatpush3.msra.mxu1 %v132_v10  ;;  %408 = vmatprep.subr.mxu0 %v465_v1  ;;  %v220_v34 = vld [vmem:[%s672_s5 + $0x18] sm:$0xff]  ;;  %v318_v35 = vld [vmem:[%s670_s3] ss:$0 sm:$0xff]  ;;  %v219_v40 = vld [vmem:[%s672_s5 + $0x10] sm:$0xff] }
  0x1b   :  { %383 = vmatprep.subr.mxu1 %v465_v1  ;;  %440 = vmatprep.mubr.msk.f32.mxu0 %vm466_vm0, %v465_v1  ;;  %v218_v41 = vld [vmem:[%s672_s5 + $0x8] sm:$0xff]  ;;  %v217_v42 = vld [vmem:[%s672_s5] sm:$0xff] }
  0x1c   :  { %384 = vmatpush3.msra.mxu1 %v131_v11  ;;  %409 = vmatpush3.msra.mxu0 %v232_v22  ;;  %v320_v43 = vld [vmem:[%s670_s3 + $0x1] ss:$0 sm:$0xff]  ;;  %v214_v45 = vstv %s212_s4 }
  0x1d   :  { %385 = vmatprep.subr.mxu1 %v465_v1  ;;  %410 = vmatprep.subr.mxu0 %v465_v1 }
  0x1e   :  { %386 = vmatpush3.msra.mxu1 %v130_v12  ;;  %411 = vmatpush3.msra.mxu0 %v231_v23 }
  0x1f   :  { %387 = vmatprep.subr.mxu1 %v465_v1  ;;  %412 = vmatprep.subr.mxu0 %v465_v1 }
  0x20   :  { %388 = vmatpush3.msra.mxu1 %v129_v13  ;;  %413 = vmatpush3.msra.mxu0 %v230_v24 }
  0x21   :  { %389 = vmatprep.subr.mxu1 %v465_v1  ;;  %414 = vmatprep.subr.mxu0 %v465_v1 }
  0x22   :  { %390 = vmatpush3.msra.mxu1 %v128_v14  ;;  %415 = vmatpush3.msra.mxu0 %v229_v25 }
  0x23   :  { %391 = vmatprep.subr.mxu1 %v465_v1  ;;  %416 = vmatprep.subr.mxu0 %v465_v1 }
  0x24   :  { %392 = vmatpush3.msra.mxu1 %v127_v15  ;;  %417 = vmatpush3.msra.mxu0 %v228_v26 }
  0x25   :  { %393 = vmatprep.subr.mxu1 %v465_v1  ;;  %418 = vmatprep.subr.mxu0 %v465_v1 }
  0x26   :  { %394 = vmatpush3.msra.mxu1 %v126_v16  ;;  %419 = vmatpush3.msra.mxu0 %v227_v27 }
  0x27   :  { %395 = vmatprep.subr.mxu1 %v465_v1  ;;  %420 = vmatprep.subr.mxu0 %v465_v1 }
  0x28   :  { %396 = vmatpush3.msra.mxu1 %v125_v17  ;;  %421 = vmatpush3.msra.mxu0 %v226_v28 }
  0x29   :  { %397 = vmatprep.subr.mxu1 %v465_v1  ;;  %422 = vmatprep.subr.mxu0 %v465_v1 }
  0x2a   :  { %398 = vmatpush3.msra.mxu1 %v124_v18  ;;  %423 = vmatpush3.msra.mxu0 %v225_v29 }
  0x2b   :  { %399 = vmatprep.subr.mxu1 %v465_v1  ;;  %424 = vmatprep.subr.mxu0 %v465_v1 }
  0x2c   :  { %400 = vmatpush3.msra.mxu1 %v123_v19  ;;  %425 = vmatpush3.msra.mxu0 %v224_v30 }
  0x2d   :  { %401 = vmatprep.subr.mxu1 %v465_v1  ;;  %426 = vmatprep.subr.mxu0 %v465_v1 }
  0x2e   :  { %402 = vmatpush3.msra.mxu1 %v122_v20  ;;  %427 = vmatpush3.msra.mxu0 %v223_v31 }
  0x2f   :  { %403 = vmatprep.subr.mxu1 %v465_v1  ;;  %428 = vmatprep.subr.mxu0 %v465_v1 }
  0x30   :  { %404 = vmatpush3.msra.mxu1 %v121_v21  ;;  %429 = vmatpush3.msra.mxu0 %v222_v32 }
  0x31   :  { %430 = vmatprep.subr.mxu0 %v465_v1 }
  0x32   :  { %431 = vmatpush3.msra.mxu0 %v221_v33 }
  0x33   :  { %432 = vmatprep.subr.mxu0 %v465_v1 }
  0x34   :  { %433 = vmatpush3.msra.mxu0 %v220_v34 }
  0x35   :  { %434 = vmatprep.subr.mxu0 %v465_v1 }
  0x36   :  { %435 = vmatpush3.msra.mxu0 %v219_v40 }
  0x37   :  { %436 = vmatprep.subr.mxu0 %v465_v1 }
  0x38   :  { %437 = vmatpush3.msra.mxu0 %v218_v41 }
  0x39   :  { %438 = vmatprep.subr.mxu0 %v465_v1 }
  0x3a   :  { %439 = vmatpush3.msra.mxu0 %v217_v42 }
  0xd8   :  { %v116_v36 = vpop.f32.mrf.mxu0 }
  0xd9   :  { %v117_v37 = vadd.f32 %v318_v35, %v116_v36 }
  0xda   :  { %v372_v38 = vpop.f32.mrf.mxu0 }
  0xdb   :  { %v120_v39 = vmax.f32 %v117_v37, 0.0 }
  0xdd   :  { %406 = vmatmul.mubr.f32.vlgmr.msra.gmra.mxu1 %v120_v39 }
 0x19d   :  { %v208_v44 = vpop.f32.mrf.mxu1 }
 0x19e   :  { %v209_v46 = vadd.f32 %v320_v43, %v208_v44 }
 0x19f   :  { %v407_v47 = vpop.f32.mrf.mxu1 }
 0x1a0   :  { %vm213_vm2 = vcmp.gt.f32.partialorder %v209_v46, 0.0  ;;  %v215_v48 = vmul.f32 %v214_v45, %v209_v46 }
 0x1a2   :  { %v216_v49 = vsel %vm213_vm2, %v209_v46, %v215_v48 }
 0x1a3   :  { %441 = vmatmul.mubr.f32.vlgmr.msra.gmra.mxu0 %v216_v49 }
 0x263   :  { %v301_v51 = vpop.f32.mrf.mxu0 }
 0x264   :  { %v302_v52 = vadd.f32 %v301_v51, %v234_v50 }
 0x265   :  { %v442_v53 = vpop.f32.mrf.mxu0 }
 0x266   :  { %v322_v54 = vmul.f32 -1.442695, %v302_v52 }
 0x268   :  { %446 = vpow2.f32 %v322_v54 }
 0x275   :  { %v447_v55 = vpop.eup %446 }
 0x276   :  { %v308_v56 = vadd.f32 1.0, %v447_v55 }
 0x278   :  { %448 = vrcp.f32 %v308_v56 }
 0x285   :  { %v449_v57 = vpop.eup %448 }
 0x286   :  { %312 = vst.msk [vmem:[%s673_s6] sm:$0xff] %vm311_vm3, %v449_v57 }
 0x287   :  { %317 = vsyncpa [#allocation3], 1 }

</bundles_post_ra>
